<compile_context>
chip_gen: v7x
topology: tpu7x:2x2x1
jax: 0.10.0
libtpu: 0.0.40
codegen_flags: <defaults>
</compile_context>

<pallas_src>
import jax
import jax.numpy as jnp
from jax.experimental import pallas as pl
from jax.experimental.pallas import tpu as pltpu

N_INPUT_DIMS = 3
N_OUTPUT_DIMS = 1
N_NEURONS = 64
N_HIDDEN_LAYERS = 3

FEAT_PAD = 8       # per-group input features padded 3 -> 8 sublanes
OUT_ROWS = 8       # output rows padded to 8 sublanes (rows 0..G-1 are real)
LANE_ALIGN = 256   # batch-lane tile granularity (multiple of 128)
TM_DEFAULT = 4096  # default lane tile; one grid step handles G*TM batch rows


def _cdiv(a, b):
    return (a + b - 1) // b


def _round_up(n, m):
    return _cdiv(n, m) * m


def _detect_tpu():
    """(groups, tensorcores-per-pallas_call) for the local TPU generation.

    groups: how many 64-wide replicas to pack block-diagonally.  256x256-MXU
    parts (v6e/v7x) want 4; 128x128-MXU parts (v2-v5) want 2 (4 would just
    multiply zero off-diagonal quadrants).  Falls back to (4, 1)."""
    groups, cores = 4, 1
    try:
        kind = jax.devices()[0].device_kind.lower()
    except Exception:
        return groups, cores
    if any(tag in kind for tag in ("v2", "v3", "v4", "v5")):
        groups = 2          # 128x128 MXU generations
    if "v7" in kind:
        cores = 2           # v7x: two TensorCores share one pallas_call grid
    return groups, cores


def _choose_tiling(batch, tm_request, groups, cores):
    """Pick (lane tile, padded lane count).  Single big tile on 1-TC parts;
    an even number of equal steps on 2-TC parts (v7x) so both cores stay busy."""
    lanes = _round_up(_cdiv(batch, groups), LANE_ALIGN)
    tm = max(LANE_ALIGN, (int(tm_request) // LANE_ALIGN) * LANE_ALIGN)
    if cores >= 2 and lanes >= 2 * LANE_ALIGN:
        tm = min(tm, _round_up(_cdiv(lanes, 2), LANE_ALIGN))
        n_steps = _round_up(_cdiv(lanes, tm), 2)   # even -> no idle tail step
    else:
        tm = min(tm, lanes)
        n_steps = _cdiv(lanes, tm)
    return tm, n_steps * tm


def _block_diag(w, groups):
    m, k = w.shape
    out = jnp.zeros((groups * m, groups * k), w.dtype)
    for g in range(groups):
        out = out.at[g * m:(g + 1) * m, g * k:(g + 1) * k].set(w)
    return out


def pack_params(params, groups):
    """Transpose to [out, in], cast to bf16, and replicate block-diagonally so
    both MXU dims (contraction and output) are filled (64 -> groups*64)."""
    w0, w1, w2, w3 = params            # stored as [in_features, out_features]
    w0_t = jnp.zeros((N_NEURONS, FEAT_PAD), jnp.bfloat16)
    w0_t = w0_t.at[:, :N_INPUT_DIMS].set(w0.T.astype(jnp.bfloat16))   # (64, 8)
    w1_t = w1.T.astype(jnp.bfloat16)                                  # (64, 64)
    w2_t = w2.T.astype(jnp.bfloat16)                                  # (64, 64)
    w3_t = w3.T.astype(jnp.bfloat16)                                  # (1, 64)

    w0_bd = _block_diag(w0_t, groups)                 # (G*64, G*8)
    w1_bd = _block_diag(w1_t, groups)                 # (G*64, G*64)
    w2_bd = _block_diag(w2_t, groups)                 # (G*64, G*64)
    w3_bd = jnp.zeros((OUT_ROWS, groups * N_NEURONS), jnp.bfloat16)
    for g in range(groups):
        w3_bd = w3_bd.at[g, g * N_NEURONS:(g + 1) * N_NEURONS].set(w3_t[0])
    return w0_bd, w1_bd, w2_bd, w3_bd


def _mlp_kernel(x_ref, w0_ref, w1_ref, w2_ref, w3_ref, o_ref):
    # Packed, transposed layout (batch on the 128-lane axis):
    #   x_ref : (G*8,  tm)   bf16   sublane-group g = batch slice g
    #   w0_ref: (G*64, G*8)  bf16   block-diagonal replicas of W0^T
    #   w1/w2 : (G*64, G*64) bf16   block-diagonal replicas
    #   w3_ref: (8,    G*64) bf16   row g = W3^T replica for group g
    #   o_ref : (8,    tm)   f32    rows 0..G-1 are the per-group outputs
    # bf16 MXU inputs, f32 accumulation; ReLU in the f32 accumulator (works on
    # every generation incl. v5e's f32-only VPU), then cast back to bf16 for
    # the next dot.
    h = jnp.dot(w0_ref[...], x_ref[...], preferred_element_type=jnp.float32)
    h = jnp.maximum(h, 0.0).astype(jnp.bfloat16)
    h = jnp.dot(w1_ref[...], h, preferred_element_type=jnp.float32)
    h = jnp.maximum(h, 0.0).astype(jnp.bfloat16)
    h = jnp.dot(w2_ref[...], h, preferred_element_type=jnp.float32)
    h = jnp.maximum(h, 0.0).astype(jnp.bfloat16)
    # Output activation = 'None'; keep f32 (no bf16 round-trip before f16 cast).
    o_ref[...] = jnp.dot(w3_ref[...], h, preferred_element_type=jnp.float32)


def mlp_tcnn_forward(x, params, *, tm=TM_DEFAULT, groups=None, num_cores=None):
    """x: [B, N_INPUT_DIMS] float32.  Returns [B, N_OUTPUT_DIMS] float16."""
    B = x.shape[0]
    det_groups, det_cores = _detect_tpu()
    G = det_groups if groups is None else int(groups)
    cores = det_cores if num_cores is None else int(num_cores)
    assert 1 <= G <= OUT_ROWS

    tm_eff, Lp = _choose_tiling(B, tm, G, cores)
    Bp = G * Lp
    grid = (Lp // tm_eff,)

    # Pack the input: x_p[g*FEAT_PAD + f, l] = x[g*Lp + l, f]  (bf16, padded).
    x_pad = jnp.zeros((Bp, FEAT_PAD), jnp.bfloat16)
    x_pad = x_pad.at[:B, :N_INPUT_DIMS].set(x.astype(jnp.bfloat16))
    x_p = x_pad.reshape(G, Lp, FEAT_PAD).transpose(0, 2, 1)
    x_p = x_p.reshape(G * FEAT_PAD, Lp)

    w0_bd, w1_bd, w2_bd, w3_bd = pack_params(params, G)

    # Weight index_maps are constant across the grid, so Pallas DMAs them once
    # (~260 KiB of bf16 at G=4).
    out = pl.pallas_call(
        _mlp_kernel,
        out_shape=jax.ShapeDtypeStruct((OUT_ROWS, Lp), jnp.float32),
        grid_spec=pltpu.PrefetchScalarGridSpec(
            num_scalar_prefetch=0,
            grid=grid,
            in_specs=[
                pl.BlockSpec((G * FEAT_PAD, tm_eff), lambda i: (0, i)),
                pl.BlockSpec((G * N_NEURONS, G * FEAT_PAD), lambda i: (0, 0)),
                pl.BlockSpec((G * N_NEURONS, G * N_NEURONS), lambda i: (0, 0)),
                pl.BlockSpec((G * N_NEURONS, G * N_NEURONS), lambda i: (0, 0)),
                pl.BlockSpec((OUT_ROWS, G * N_NEURONS), lambda i: (0, 0)),
            ],
            out_specs=pl.BlockSpec((OUT_ROWS, tm_eff), lambda i: (0, i)),
        ),
        compiler_params=pltpu.CompilerParams(
            dimension_semantics=("parallel",),
            vmem_limit_bytes=32 * 1024 * 1024,
        ),
    )(x_p, w0_bd, w1_bd, w2_bd, w3_bd)

    # Rows 0..G-1 hold the per-group outputs; flat index g*Lp + l == batch row.
    y = out[:G].reshape(-1)[:B].astype(jnp.float16).reshape(B, N_OUTPUT_DIMS)
    return y


def init_params(seed=1337):
    """Deterministic synthetic weights (tcnn-style uniform init, stored as
    [in_features, out_features])."""
    key = jax.random.PRNGKey(seed)
    shapes = [
        (N_INPUT_DIMS, N_NEURONS),   # input layer
        (N_NEURONS, N_NEURONS),      # hidden layer 1
        (N_NEURONS, N_NEURONS),      # hidden layer 2
        (N_NEURONS, N_OUTPUT_DIMS),  # output layer
    ]
    params = []
    for shp in shapes:
        key, sub = jax.random.split(key)
        scale = (6.0 / (shp[0] + shp[1])) ** 0.5
        params.append(
            jax.random.uniform(sub, shp, jnp.float32, minval=-scale, maxval=scale))
    return tuple(params)


def reference_forward(x, params):
    w0, w1, w2, w3 = params
    h = jnp.maximum(x @ w0, 0.0)
    h = jnp.maximum(h @ w1, 0.0)
    h = jnp.maximum(h @ w2, 0.0)
    return (h @ w3).astype(jnp.float16)


if __name__ == "__main__":
    key = jax.random.PRNGKey(0)
    B = 100
    x = jax.random.normal(key, (B, N_INPUT_DIMS), jnp.float32)

    params = init_params(seed=1337)

    y = mlp_tcnn_forward(x, params)
    y = jax.block_until_ready(y)

    y_ref = reference_forward(x, params)
    assert y.shape == (B, N_OUTPUT_DIMS), y.shape
    assert y.dtype == jnp.float16, y.dtype
    # Kernel uses bf16 MXU inputs / f32 accumulation (tinycudann uses fp16
    # internally), so compare against the f32 reference with a tolerance.
    diff = jnp.max(jnp.abs(y.astype(jnp.float32) - y_ref.astype(jnp.float32)))
    assert jnp.allclose(y.astype(jnp.float32), y_ref.astype(jnp.float32),
                        atol=2e-2, rtol=2e-2), f"max abs diff {diff}"
    print("KERNEL_OK")
</pallas_src>

<mosaic_0001>
module attributes {stable_mosaic.version = 11 : i64} {
  func.func @_mlp_kernel(%arg0: i32, %arg1: memref<32x256xbf16, #tpu.memory_space<vmem>>, %arg2: memref<256x32xbf16, #tpu.memory_space<vmem>>, %arg3: memref<256x256xbf16, #tpu.memory_space<vmem>>, %arg4: memref<256x256xbf16, #tpu.memory_space<vmem>>, %arg5: memref<8x256xbf16, #tpu.memory_space<vmem>>, %arg6: memref<8x256xf32, #tpu.memory_space<vmem>>) attributes {dimension_semantics = [#tpu.dimension_semantics<parallel>], iteration_bounds = array<i64: 1>, scalar_prefetch = 0 : i64, scratch_operands = 0 : i64, tpu.core_type = #tpu.core_type<tc>, window_params = [{transform_indices = @transform_0, window_bounds = array<i64: 32, 256>}, {pipeline_mode = #tpu.pipeline_mode<synchronous>, transform_indices = @transform_1, window_bounds = array<i64: 256, 32>}, {pipeline_mode = #tpu.pipeline_mode<synchronous>, transform_indices = @transform_2, window_bounds = array<i64: 256, 256>}, {pipeline_mode = #tpu.pipeline_mode<synchronous>, transform_indices = @transform_3, window_bounds = array<i64: 256, 256>}, {pipeline_mode = #tpu.pipeline_mode<synchronous>, transform_indices = @transform_4, window_bounds = array<i64: 8, 256>}, {transform_indices = @transform_5, window_bounds = array<i64: 8, 256>}]} {
    %c0 = arith.constant 0 : index
    %c0_0 = arith.constant 0 : index
    %0 = vector.load %arg2[%c0, %c0_0] : memref<256x32xbf16, #tpu.memory_space<vmem>>, vector<256x32xbf16>
    %c0_1 = arith.constant 0 : index
    %c0_2 = arith.constant 0 : index
    %1 = vector.load %arg1[%c0_1, %c0_2] : memref<32x256xbf16, #tpu.memory_space<vmem>>, vector<32x256xbf16>
    %cst = arith.constant dense<0.000000e+00> : vector<256x256xf32>
    %2 = tpu.matmul %0, %1, %cst {dimension_numbers = #tpu.dot_dimension_numbers<[1], [0], [0], [1], [0, 0, 1, 1], [], []>} : vector<256x32xbf16>, vector<32x256xbf16>, vector<256x256xf32> -> vector<256x256xf32>
    %cst_3 = arith.constant 0.000000e+00 : f32
    %3 = vector.broadcast %cst_3 : f32 to vector<256x256xf32>
    %4 = arith.maximumf %2, %3 : vector<256x256xf32>
    %5 = arith.truncf %4 : vector<256x256xf32> to vector<256x256xbf16>
    %c0_4 = arith.constant 0 : index
    %c0_5 = arith.constant 0 : index
    %6 = vector.load %arg3[%c0_4, %c0_5] : memref<256x256xbf16, #tpu.memory_space<vmem>>, vector<256x256xbf16>
    %cst_6 = arith.constant dense<0.000000e+00> : vector<256x256xf32>
    %7 = tpu.matmul %6, %5, %cst_6 {dimension_numbers = #tpu.dot_dimension_numbers<[1], [0], [0], [1], [0, 0, 1, 1], [], []>} : vector<256x256xbf16>, vector<256x256xbf16>, vector<256x256xf32> -> vector<256x256xf32>
    %cst_7 = arith.constant 0.000000e+00 : f32
    %8 = vector.broadcast %cst_7 : f32 to vector<256x256xf32>
    %9 = arith.maximumf %7, %8 : vector<256x256xf32>
    %10 = arith.truncf %9 : vector<256x256xf32> to vector<256x256xbf16>
    %c0_8 = arith.constant 0 : index
    %c0_9 = arith.constant 0 : index
    %11 = vector.load %arg4[%c0_8, %c0_9] : memref<256x256xbf16, #tpu.memory_space<vmem>>, vector<256x256xbf16>
    %cst_10 = arith.constant dense<0.000000e+00> : vector<256x256xf32>
    %12 = tpu.matmul %11, %10, %cst_10 {dimension_numbers = #tpu.dot_dimension_numbers<[1], [0], [0], [1], [0, 0, 1, 1], [], []>} : vector<256x256xbf16>, vector<256x256xbf16>, vector<256x256xf32> -> vector<256x256xf32>
    %cst_11 = arith.constant 0.000000e+00 : f32
    %13 = vector.broadcast %cst_11 : f32 to vector<256x256xf32>
    %14 = arith.maximumf %12, %13 : vector<256x256xf32>
    %15 = arith.truncf %14 : vector<256x256xf32> to vector<256x256xbf16>
    %c0_12 = arith.constant 0 : index
    %c0_13 = arith.constant 0 : index
    %16 = vector.load %arg5[%c0_12, %c0_13] : memref<8x256xbf16, #tpu.memory_space<vmem>>, vector<8x256xbf16>
    %cst_14 = arith.constant dense<0.000000e+00> : vector<8x256xf32>
    %17 = tpu.matmul %16, %15, %cst_14 {dimension_numbers = #tpu.dot_dimension_numbers<[1], [0], [0], [1], [0, 0, 1, 1], [], []>} : vector<8x256xbf16>, vector<256x256xbf16>, vector<8x256xf32> -> vector<8x256xf32>
    %c0_15 = arith.constant 0 : index
    %c0_16 = arith.constant 0 : index
    %18 = vector.load %arg6[%c0_15, %c0_16] : memref<8x256xf32, #tpu.memory_space<vmem>>, vector<8x256xf32>
    tpu.vector_store %arg6[%c0_15, %c0_16], %17 {strides = array<i32>} : memref<8x256xf32, #tpu.memory_space<vmem>>, vector<8x256xf32>,
    return
  }
  func.func @transform_0(%arg0: i32) -> (i32, i32) {
    %c0_i32 = arith.constant 0 : i32
    %c0_i32_0 = arith.constant 0 : i32
    return %c0_i32, %arg0 : i32, i32
  }
  func.func @transform_1(%arg0: i32) -> (i32, i32) {
    %c0_i32 = arith.constant 0 : i32
    %c0_i32_0 = arith.constant 0 : i32
    %c0_i32_1 = arith.constant 0 : i32
    return %c0_i32, %c0_i32_0 : i32, i32
  }
  func.func @transform_2(%arg0: i32) -> (i32, i32) {
    %c0_i32 = arith.constant 0 : i32
    %c0_i32_0 = arith.constant 0 : i32
    %c0_i32_1 = arith.constant 0 : i32
    return %c0_i32, %c0_i32_0 : i32, i32
  }
  func.func @transform_3(%arg0: i32) -> (i32, i32) {
    %c0_i32 = arith.constant 0 : i32
    %c0_i32_0 = arith.constant 0 : i32
    %c0_i32_1 = arith.constant 0 : i32
    return %c0_i32, %c0_i32_0 : i32, i32
  }
  func.func @transform_4(%arg0: i32) -> (i32, i32) {
    %c0_i32 = arith.constant 0 : i32
    %c0_i32_0 = arith.constant 0 : i32
    %c0_i32_1 = arith.constant 0 : i32
    return %c0_i32, %c0_i32_0 : i32, i32
  }
  func.func @transform_5(%arg0: i32) -> (i32, i32) {
    %c0_i32 = arith.constant 0 : i32
    %c0_i32_0 = arith.constant 0 : i32
    return %c0_i32, %arg0 : i32, i32
  }
}

</mosaic_0001>

<bundles_post_ra>
// kernel: tpu_custom_call.1
= control target key start
LH: loop header
LB: loop body
LE: loop exit
PB: predicated region body
PF: predicated region fallthrough
CT: control target
= control target key end

     0   :  { %10 = vsyncpa [#allocation3], 0  ;;  %s2044_s0 = inlined_call_operand.vmem [shape: bf16[32,256], index: 0, kind: input, shape index: {}]   ;;  %s2045_s1 = inlined_call_operand.vmem [shape: bf16[256,32], index: 1, kind: input, shape index: {}]   ;;  %s2046_s2 = inlined_call_operand.hbm [shape: bf16[256,256], index: 2, kind: input, shape index: {}]   ;;  %s2047_s3 = inlined_call_operand.hbm [shape: bf16[256,256], index: 3, kind: input, shape index: {}]   ;;  %s2048_s4 = inlined_call_operand.vmem [shape: bf16[8,256], index: 4, kind: input, shape index: {}]   ;;  %s2049_s5 = inlined_call_operand.hbm [shape: f32[8,256], index: 5, kind: output, shape index: {}]  }
   0x1   :  { %11 = vsyncpa [#allocation6], 0 }
   0x2   :  { %12 = vsyncpa [#allocation4], 0  ;;  %s1857_s18 = smov [#allocation2]   ;;  %s1785_s22 = scalar_lea.hbm %s2046_s2, 4096 }
   0x3   :  { %s22_s19 = sshll.u32 %s1857_s18, 4  ;;  %p1786_p0 = scmp.ne.s32.totalorder %s2046_s2, %s1785_s22  ;;  %s23_s19 = int_to_ptr.vmem [resolvable:$true] %s22_s19 }
   0x4   :  { %p1789_p1 = scmp.lt.u32.totalorder %s1785_s22, %s2046_s2 }
   0x6   :  { %p1791_p2 = pnand %p1789_p1, %p1786_p0 }
   0x8   :  { %1794 = shalt.err (!%p1791_p2)
}
   0x9   :  { %s1795_s27 = scalar_lea.vmem %s23_s19, 4096  ;;  %p1800_p4 = scmp.lt.s32.totalorder %s23_s19, %s23_s19 }
   0xa   :  { %p1796_p3 = scmp.ne.s32.totalorder %s23_s19, %s1795_s27  ;;  %p1801_p5 = scmp.lt.s32.totalorder %s1795_s27, %s1795_s27 }
   0xc   :  { %p1802_p6 = por %p1801_p5, %p1800_p4 }
   0xe   :  { %p1803_p7 = pnand %p1802_p6, %p1796_p3 }
  0x10   :  { %1806 = shalt.err (!%p1803_p7)
}
  0x11   :  { %s1858_s28 = smov 128   ;;  %s1859_s29 = smov 8  }
  0x12   :  { %28 = dma.hbm_to_vmem [thread:$0]  %s2046_s2, 4096, %s23_s19, [#allocation3], %s1858_s28, %s1858_s28, %s1859_s29  }
  0x13   :  { %s1860_s7 = smov [#allocation5]   ;;  %s1807_s11 = scalar_lea.hbm %s2047_s3, 4096 }
  0x14   :  { %s34_s8 = sshll.u32 %s1860_s7, 4  ;;  %p1808_p8 = scmp.ne.s32.totalorder %s2047_s3, %s1807_s11  ;;  %s35_s8 = int_to_ptr.vmem [resolvable:$true] %s34_s8 }
  0x15   :  { %p1811_p9 = scmp.lt.u32.totalorder %s1807_s11, %s2047_s3 }
  0x17   :  { %p1813_p10 = pnand %p1811_p9, %p1808_p8 }
  0x19   :  { %1816 = shalt.err (!%p1813_p10)
}
  0x1a   :  { %s1817_s16 = scalar_lea.vmem %s35_s8, 4096  ;;  %p1822_p12 = scmp.lt.s32.totalorder %s35_s8, %s35_s8 }
  0x1b   :  { %p1818_p11 = scmp.ne.s32.totalorder %s35_s8, %s1817_s16  ;;  %p1823_p13 = scmp.lt.s32.totalorder %s1817_s16, %s1817_s16 }
  0x1d   :  { %p1824_p0 = por %p1823_p13, %p1822_p12 }
  0x1f   :  { %p1825_p1 = pnand %p1824_p0, %p1818_p11 }
  0x21   :  { %1828 = shalt.err (!%p1825_p1)
}
  0x22   :  { %40 = dma.hbm_to_vmem [thread:$0]  %s2047_s3, 4096, %s35_s8, [#allocation6], %s1858_s28, %s1858_s28, %s1859_s29  }
  0x23   :  { %1851 = dma.done.wait [#allocation3], 4096  }
  0x24   :  { %1852 = vsyncadd [#allocation3], 4294963200 }
  0x25   :  { %1853 = dma.done.wait [#allocation6], 4096  }
  0x26   :  { %1854 = vsyncadd [#allocation6], 4294963200  ;;  %v1861_v0 = vmov 0   ;;  %v1665_v1 = vld [vmem:[%s2044_s0 + $0x4] ss:$8 sps:$4 sm:$0xff]   ;;  %vm186_vm0 = vcmask 261120  }
  0x27   :  { %267 = vmatprep.mubr.bf16.mxu0 %v1861_v0  ;;  %347 = vmatprep.mubr.bf16.mxu1 %v1861_v0  ;;  %v1667_v2 = vld [vmem:[%s2044_s0] ss:$8 sps:$4 sm:$0xff]   ;;  %v1668_v3 = vld [vmem:[%s2044_s0 + $0x14] ss:$8 sps:$4 sm:$0xff]   ;;  %v1670_v4 = vld [vmem:[%s2044_s0 + $0x10] ss:$8 sps:$4 sm:$0xff]  }
  0x28   :  { %235 = vmatprep.subr.bf16.mxu0 %v1665_v1  ;;  %1655 = vmatprep.subr.bf16.mxu1 %v1665_v1  ;;  %v1671_v5 = vld [vmem:[%s2045_s1] sm:$0xff]   ;;  %v1672_v7 = vld [vmem:[%s2045_s1 + $0x8] sm:$0xff]   ;;  %v1673_v9 = vld [vmem:[%s2045_s1 + $0x10] sm:$0xff]  }
  0x29   :  { %236 = vmatpush1.bf16.msra.mxu0 %v1667_v2  ;;  %1657 = vmatpush1.bf16.msra.mxu1 %v1667_v2  ;;  %v1675_v6 = vld [vmem:[%s2045_s1 + $0x40] sm:$0xff]   ;;  %v1677_v8 = vld [vmem:[%s2045_s1 + $0x48] sm:$0xff]   ;;  %v1679_v10 = vld [vmem:[%s2045_s1 + $0x50] sm:$0xff]  }
  0x2a   :  { %237 = vmatprep.subr.bf16.mxu0 %v1668_v3  ;;  %1656 = vmatprep.subr.bf16.mxu1 %v1668_v3  ;;  %v1674_v11 = vld [vmem:[%s2045_s1 + $0x18] sm:$0xff]   ;;  %v1676_v13 = vld [vmem:[%s2045_s1 + $0x20] sm:$0xff]   ;;  %v1678_v15 = vld [vmem:[%s2045_s1 + $0x28] sm:$0xff]  }
  0x2b   :  { %v1681_v12 = vld [vmem:[%s2045_s1 + $0x58] sm:$0xff]   ;;  %v1683_v14 = vld [vmem:[%s2045_s1 + $0x60] sm:$0xff]   ;;  %v1684_v16 = vld [vmem:[%s2045_s1 + $0x68] sm:$0xff]  }
  0x2c   :  { %v1680_v17 = vld [vmem:[%s2045_s1 + $0x30] sm:$0xff]   ;;  %v1682_v19 = vld [vmem:[%s2045_s1 + $0x38] sm:$0xff]   ;;  %v1689_v21 = vld [vmem:[#allocation2 + $0x4] ss:$8 sps:$4 sm:$0xff]  }
  0x2d   :  { %238 = vmatpush1.bf16.msra.mxu0 %v1670_v4  ;;  %1658 = vmatpush1.bf16.msra.mxu1 %v1670_v4  ;;  %v1685_v18 = vld [vmem:[%s2045_s1 + $0x70] sm:$0xff]   ;;  %v1686_v20 = vld [vmem:[%s2045_s1 + $0x78] sm:$0xff]  }
  0x30   :  { %1573 = vmatmul.mubr.msk.bf16.vlgmr.msra.gmra.mrb[0].mxu0 %vm186_vm0, %v1671_v5  ;;  %1581 = vmatmul.mubr.msk.bf16.vlgmr.msra.gmra.mrb[0].mxu1 %vm186_vm0, %v1675_v6 }
  0x31   :  { %277 = vmatprep.mubr.bf16.mxu0 %v1861_v0  ;;  %357 = vmatprep.mubr.bf16.mxu1 %v1861_v0 }
  0x38   :  { %1574 = vmatmul.mubr.msk.bf16.gmra.mrb[4].mxu0 %vm186_vm0, %v1672_v7  ;;  %1582 = vmatmul.mubr.msk.bf16.gmra.mrb[4].mxu1 %vm186_vm0, %v1677_v8 }
  0x39   :  { %287 = vmatprep.mubr.bf16.mxu0 %v1861_v0  ;;  %367 = vmatprep.mubr.bf16.mxu1 %v1861_v0 }
  0x40   :  { %1575 = vmatmul.mubr.msk.bf16.gmra.mrb[8].mxu0 %vm186_vm0, %v1673_v9  ;;  %1583 = vmatmul.mubr.msk.bf16.gmra.mrb[8].mxu1 %vm186_vm0, %v1679_v10 }
  0x41   :  { %297 = vmatprep.mubr.bf16.mxu0 %v1861_v0  ;;  %377 = vmatprep.mubr.bf16.mxu1 %v1861_v0 }
  0x48   :  { %1576 = vmatmul.mubr.msk.bf16.gmra.mrb[12].mxu0 %vm186_vm0, %v1674_v11  ;;  %1584 = vmatmul.mubr.msk.bf16.gmra.mrb[12].mxu1 %vm186_vm0, %v1681_v12 }
  0x49   :  { %307 = vmatprep.mubr.bf16.mxu0 %v1861_v0  ;;  %387 = vmatprep.mubr.bf16.mxu1 %v1861_v0 }
  0x50   :  { %1577 = vmatmul.mubr.msk.bf16.gmra.mrb[16].mxu0 %vm186_vm0, %v1676_v13  ;;  %1585 = vmatmul.mubr.msk.bf16.gmra.mrb[16].mxu1 %vm186_vm0, %v1683_v14 }
  0x51   :  { %317 = vmatprep.mubr.bf16.mxu0 %v1861_v0  ;;  %397 = vmatprep.mubr.bf16.mxu1 %v1861_v0 }
  0x58   :  { %1578 = vmatmul.mubr.msk.bf16.gmra.mrb[20].mxu0 %vm186_vm0, %v1678_v15  ;;  %1586 = vmatmul.mubr.msk.bf16.gmra.mrb[20].mxu1 %vm186_vm0, %v1684_v16 }
  0x59   :  { %327 = vmatprep.mubr.bf16.mxu0 %v1861_v0  ;;  %407 = vmatprep.mubr.bf16.mxu1 %v1861_v0 }
  0x60   :  { %1579 = vmatmul.mubr.msk.bf16.gmra.mrb[24].mxu0 %vm186_vm0, %v1680_v17  ;;  %1587 = vmatmul.mubr.msk.bf16.gmra.mrb[24].mxu1 %vm186_vm0, %v1685_v18 }
  0x61   :  { %337 = vmatprep.mubr.bf16.mxu0 %v1861_v0  ;;  %417 = vmatprep.mubr.bf16.mxu1 %v1861_v0 }
  0x68   :  { %1580 = vmatmul.mubr.msk.bf16.gmra.mrb[28].mxu0 %vm186_vm0, %v1682_v19  ;;  %1588 = vmatmul.mubr.msk.bf16.gmra.mrb[28].mxu1 %vm186_vm0, %v1686_v20 }
  0x69   :  { %748 = vmatprep.mubr.bf16.mxu1 %v1689_v21 }
 0x103   :  { %v269_v22 = vpop.f32.mrb[0].mxu0  ;;  %v349_v23 = vpop.f32.mrb[0].mxu1 }
 0x104   :  { %v271_v24 = vpop.f32.mrb[1].mxu0  ;;  %v460_v25 = vmax.f32 %v349_v23, 0.0  ;;  %v351_v26 = vpop.f32.mrb[1].mxu1  ;;  %v428_v30 = vmax.f32 %v269_v22, 0.0 }
 0x105   :  { %v273_v27 = vpop.f32.mrb[2].mxu0  ;;  %v461_v28 = vmax.f32 %v351_v26, 0.0  ;;  %v353_v29 = vpop.f32.mrb[2].mxu1  ;;  %v429_v35 = vmax.f32 %v271_v24, 0.0 }
 0x106   :  { %v430_v31 = vmax.f32 %v273_v27, 0.0  ;;  %v275_v32 = vpop.f32.mrb[3].mxu0  ;;  %v462_v33 = vmax.f32 %v353_v29, 0.0  ;;  %v355_v34 = vpop.f32.mrb[3].mxu1 }
 0x107   :  { %v431_v36 = vmax.f32 %v275_v32, 0.0  ;;  %v463_v37 = vmax.f32 %v355_v34, 0.0 }
 0x108   :  { %v492_v38 = vpack.c.bf16 %v430_v31, %v428_v30  ;;  %v1993_v39 = vpack.c.bf16 %v462_v33, %v460_v25 }
 0x109   :  { %v493_v40 = vpack.c.bf16 %v431_v36, %v429_v35  ;;  %v1995_v41 = vpack.c.bf16 %v463_v37, %v461_v28 }
 0x10b   :  { %v279_v42 = vpop.f32.mrb[4].mxu0  ;;  %716 = vmatprep.subr.bf16.mxu1 %v493_v40  ;;  %v359_v43 = vpop.f32.mrb[4].mxu1 }
 0x10c   :  { %v281_v44 = vpop.f32.mrb[5].mxu0  ;;  %717 = vmatpush1.bf16.msra.mxu1 %v492_v38  ;;  %v464_v45 = vmax.f32 %v359_v43, 0.0  ;;  %v361_v46 = vpop.f32.mrb[5].mxu1  ;;  %v432_v50 = vmax.f32 %v279_v42, 0.0 }
 0x10d   :  { %v283_v47 = vpop.f32.mrb[6].mxu0  ;;  %v465_v48 = vmax.f32 %v361_v46, 0.0  ;;  %v363_v49 = vpop.f32.mrb[6].mxu1  ;;  %v433_v55 = vmax.f32 %v281_v44, 0.0 }
 0x10e   :  { %v434_v51 = vmax.f32 %v283_v47, 0.0  ;;  %v285_v52 = vpop.f32.mrb[7].mxu0  ;;  %v466_v53 = vmax.f32 %v363_v49, 0.0  ;;  %v365_v54 = vpop.f32.mrb[7].mxu1 }
 0x10f   :  { %v435_v56 = vmax.f32 %v285_v52, 0.0  ;;  %v467_v57 = vmax.f32 %v365_v54, 0.0 }
 0x110   :  { %v494_v58 = vpack.c.bf16 %v434_v51, %v432_v50  ;;  %v1997_v59 = vpack.c.bf16 %v466_v53, %v464_v45 }
 0x111   :  { %v495_v60 = vpack.c.bf16 %v435_v56, %v433_v55  ;;  %v1999_v61 = vpack.c.bf16 %v467_v57, %v465_v48 }
 0x113   :  { %v289_v62 = vpop.f32.mrb[8].mxu0  ;;  %718 = vmatprep.subr.bf16.mxu1 %v495_v60  ;;  %v369_v63 = vpop.f32.mrb[8].mxu1 }
 0x114   :  { %v291_v0 = vpop.f32.mrb[9].mxu0  ;;  %719 = vmatpush1.bf16.msra.mxu1 %v494_v58  ;;  %v468_v1 = vmax.f32 %v369_v63, 0.0  ;;  %v371_v2 = vpop.f32.mrb[9].mxu1  ;;  %v436_v6 = vmax.f32 %v289_v62, 0.0 }
 0x115   :  { %v293_v3 = vpop.f32.mrb[10].mxu0  ;;  %v469_v4 = vmax.f32 %v371_v2, 0.0  ;;  %v373_v5 = vpop.f32.mrb[10].mxu1  ;;  %v437_v11 = vmax.f32 %v291_v0, 0.0 }
 0x116   :  { %v438_v7 = vmax.f32 %v293_v3, 0.0  ;;  %v295_v8 = vpop.f32.mrb[11].mxu0  ;;  %v470_v9 = vmax.f32 %v373_v5, 0.0  ;;  %v375_v10 = vpop.f32.mrb[11].mxu1 }
 0x117   :  { %v439_v12 = vmax.f32 %v295_v8, 0.0  ;;  %v471_v13 = vmax.f32 %v375_v10, 0.0 }
 0x118   :  { %v496_v14 = vpack.c.bf16 %v438_v7, %v436_v6  ;;  %v2001_v15 = vpack.c.bf16 %v470_v9, %v468_v1 }
 0x119   :  { %v497_v16 = vpack.c.bf16 %v439_v12, %v437_v11  ;;  %v2003_v17 = vpack.c.bf16 %v471_v13, %v469_v4 }
 0x11b   :  { %v299_v18 = vpop.f32.mrb[12].mxu0  ;;  %720 = vmatprep.subr.bf16.mxu1 %v497_v16  ;;  %v379_v19 = vpop.f32.mrb[12].mxu1 }
 0x11c   :  { %v301_v20 = vpop.f32.mrb[13].mxu0  ;;  %721 = vmatpush1.bf16.msra.mxu1 %v496_v14  ;;  %v472_v21 = vmax.f32 %v379_v19, 0.0  ;;  %v381_v22 = vpop.f32.mrb[13].mxu1  ;;  %v440_v26 = vmax.f32 %v299_v18, 0.0 }
 0x11d   :  { %v303_v23 = vpop.f32.mrb[14].mxu0  ;;  %v473_v24 = vmax.f32 %v381_v22, 0.0  ;;  %v383_v25 = vpop.f32.mrb[14].mxu1  ;;  %v441_v31 = vmax.f32 %v301_v20, 0.0 }
 0x11e   :  { %v442_v27 = vmax.f32 %v303_v23, 0.0  ;;  %v305_v28 = vpop.f32.mrb[15].mxu0  ;;  %v474_v29 = vmax.f32 %v383_v25, 0.0  ;;  %v385_v30 = vpop.f32.mrb[15].mxu1 }
 0x11f   :  { %v443_v32 = vmax.f32 %v305_v28, 0.0  ;;  %v475_v33 = vmax.f32 %v385_v30, 0.0 }
 0x120   :  { %v498_v34 = vpack.c.bf16 %v442_v27, %v440_v26  ;;  %v2005_v35 = vpack.c.bf16 %v474_v29, %v472_v21 }
 0x121   :  { %v499_v36 = vpack.c.bf16 %v443_v32, %v441_v31  ;;  %v2007_v37 = vpack.c.bf16 %v475_v33, %v473_v24 }
 0x123   :  { %v309_v38 = vpop.f32.mrb[16].mxu0  ;;  %722 = vmatprep.subr.bf16.mxu1 %v499_v36  ;;  %v389_v40 = vpop.f32.mrb[16].mxu1 }
 0x124   :  { %v311_v42 = vpop.f32.mrb[17].mxu0  ;;  %723 = vmatpush1.bf16.msra.mxu1 %v498_v34  ;;  %v476_v43 = vmax.f32 %v389_v40, 0.0  ;;  %v391_v44 = vpop.f32.mrb[17].mxu1  ;;  %v444_v48 = vmax.f32 %v309_v38, 0.0 }
 0x125   :  { %v313_v45 = vpop.f32.mrb[18].mxu0  ;;  %v477_v46 = vmax.f32 %v391_v44, 0.0  ;;  %v393_v47 = vpop.f32.mrb[18].mxu1  ;;  %v445_v53 = vmax.f32 %v311_v42, 0.0 }
 0x126   :  { %v446_v49 = vmax.f32 %v313_v45, 0.0  ;;  %v315_v50 = vpop.f32.mrb[19].mxu0  ;;  %v478_v51 = vmax.f32 %v393_v47, 0.0  ;;  %v395_v52 = vpop.f32.mrb[19].mxu1 }
 0x127   :  { %v447_v54 = vmax.f32 %v315_v50, 0.0  ;;  %v479_v55 = vmax.f32 %v395_v52, 0.0 }
 0x128   :  { %v500_v56 = vpack.c.bf16 %v446_v49, %v444_v48  ;;  %v2009_v57 = vpack.c.bf16 %v478_v51, %v476_v43 }
 0x129   :  { %v501_v58 = vpack.c.bf16 %v447_v54, %v445_v53  ;;  %v2011_v60 = vpack.c.bf16 %v479_v55, %v477_v46 }
 0x12b   :  { %v319_v62 = vpop.f32.mrb[20].mxu0  ;;  %724 = vmatprep.subr.bf16.mxu1 %v501_v58  ;;  %v399_v63 = vpop.f32.mrb[20].mxu1 }
 0x12c   :  { %v321_v0 = vpop.f32.mrb[21].mxu0  ;;  %725 = vmatpush1.bf16.msra.mxu1 %v500_v56  ;;  %v480_v1 = vmax.f32 %v399_v63, 0.0  ;;  %v401_v2 = vpop.f32.mrb[21].mxu1  ;;  %v448_v6 = vmax.f32 %v319_v62, 0.0 }
 0x12d   :  { %v323_v3 = vpop.f32.mrb[22].mxu0  ;;  %v481_v4 = vmax.f32 %v401_v2, 0.0  ;;  %v403_v5 = vpop.f32.mrb[22].mxu1  ;;  %v449_v11 = vmax.f32 %v321_v0, 0.0 }
 0x12e   :  { %v450_v7 = vmax.f32 %v323_v3, 0.0  ;;  %v325_v8 = vpop.f32.mrb[23].mxu0  ;;  %v482_v9 = vmax.f32 %v403_v5, 0.0  ;;  %v405_v10 = vpop.f32.mrb[23].mxu1  ;;  %v1705_v5 = vld [vmem:[#allocation2 + $0x64] ss:$8 sps:$4 sm:$0xff]  }
 0x12f   :  { %v451_v12 = vmax.f32 %v325_v8, 0.0  ;;  %v483_v13 = vmax.f32 %v405_v10, 0.0  ;;  %v1710_v8 = vld [vmem:[#allocation2 + $0x70] ss:$8 sps:$4 sm:$0xff]   ;;  %v1713_v10 = vld [vmem:[#allocation2 + $0x80] ss:$8 sps:$4 sm:$0xff]  }
 0x130   :  { %v502_v14 = vpack.c.bf16 %v450_v7, %v448_v6  ;;  %v518_v16 = vpack.c.bf16 %v482_v9, %v480_v1  ;;  %v1707_v6 = vld [vmem:[#allocation2 + $0x60] ss:$8 sps:$4 sm:$0xff]   ;;  %v1708_v7 = vld [vmem:[#allocation2 + $0x74] ss:$8 sps:$4 sm:$0xff]   ;;  %v1711_v9 = vld [vmem:[#allocation2 + $0x84] ss:$8 sps:$4 sm:$0xff]  }
 0x131   :  { %v503_v18 = vpack.c.bf16 %v451_v12, %v449_v11  ;;  %v519_v19 = vpack.c.bf16 %v483_v13, %v481_v4  ;;  %v1704_v4 = vld [vmem:[#allocation2 + $0x50] ss:$8 sps:$4 sm:$0xff]   ;;  %v1714_v11 = vld [vmem:[#allocation2 + $0x94] ss:$8 sps:$4 sm:$0xff]   ;;  %v1717_v13 = vld [vmem:[#allocation2 + $0xa4] ss:$8 sps:$4 sm:$0xff]  }
 0x132   :  { %v1716_v12 = vld [vmem:[#allocation2 + $0x90] ss:$8 sps:$4 sm:$0xff]  }
 0x133   :  { %v329_v20 = vpop.f32.mrb[24].mxu0  ;;  %726 = vmatprep.subr.bf16.mxu1 %v503_v18  ;;  %v409_v21 = vpop.f32.mrb[24].mxu1  ;;  %v1722_v18 = vld [vmem:[#allocation2 + $0xb0] ss:$8 sps:$4 sm:$0xff]  }
 0x134   :  { %v331_v22 = vpop.f32.mrb[25].mxu0  ;;  %727 = vmatpush1.bf16.msra.mxu1 %v502_v14  ;;  %v484_v23 = vmax.f32 %v409_v21, 0.0  ;;  %v411_v24 = vpop.f32.mrb[25].mxu1  ;;  %v452_v28 = vmax.f32 %v329_v20, 0.0  ;;  %v1719_v14 = vld [vmem:[#allocation2 + $0xa0] ss:$8 sps:$4 sm:$0xff]  }
 0x135   :  { %v333_v25 = vpop.f32.mrb[26].mxu0  ;;  %v485_v26 = vmax.f32 %v411_v24, 0.0  ;;  %v413_v27 = vpop.f32.mrb[26].mxu1  ;;  %v453_v33 = vmax.f32 %v331_v22, 0.0  ;;  %v1725_v20 = vld [vmem:[#allocation2 + $0xc0] ss:$8 sps:$4 sm:$0xff]  }
 0x136   :  { %v454_v29 = vmax.f32 %v333_v25, 0.0  ;;  %v335_v30 = vpop.f32.mrb[27].mxu0  ;;  %v486_v31 = vmax.f32 %v413_v27, 0.0  ;;  %v415_v32 = vpop.f32.mrb[27].mxu1  ;;  %v1726_v21 = vld [vmem:[#allocation2 + $0xd4] ss:$8 sps:$4 sm:$0xff]  }
 0x137   :  { %v455_v34 = vmax.f32 %v335_v30, 0.0  ;;  %v487_v36 = vmax.f32 %v415_v32, 0.0  ;;  %v1728_v22 = vld [vmem:[#allocation2 + $0xd0] ss:$8 sps:$4 sm:$0xff]   ;;  %v1731_v24 = vld [vmem:[#allocation2 + $0xe0] ss:$8 sps:$4 sm:$0xff]  }
 0x138   :  { %v504_v38 = vpack.c.bf16 %v454_v29, %v452_v28  ;;  %v520_v40 = vpack.c.bf16 %v486_v31, %v484_v23  ;;  %v1729_v23 = vld [vmem:[#allocation2 + $0xe4] ss:$8 sps:$4 sm:$0xff]   ;;  %v1732_v25 = vld [vmem:[#allocation2 + $0xf4] ss:$8 sps:$4 sm:$0xff]  }
 0x139   :  { %v505_v42 = vpack.c.bf16 %v455_v34, %v453_v33  ;;  %v521_v43 = vpack.c.bf16 %v487_v36, %v485_v26  ;;  %v1734_v26 = vld [vmem:[#allocation2 + $0xf0] ss:$8 sps:$4 sm:$0xff]   ;;  %v1737_v29 = vld [vmem:[#allocation5 + $0x4] ss:$8 sps:$4 sm:$0xff]  }
 0x13a   :  { %1229 = vmatprep.mubr.bf16.mxu0 %v1737_v29 }
 0x13b   :  { %v339_v44 = vpop.f32.mrb[28].mxu0  ;;  %728 = vmatprep.subr.bf16.mxu1 %v505_v42  ;;  %v419_v45 = vpop.f32.mrb[28].mxu1 }
 0x13c   :  { %v341_v46 = vpop.f32.mrb[29].mxu0  ;;  %729 = vmatpush1.bf16.msra.mxu1 %v504_v38  ;;  %v488_v47 = vmax.f32 %v419_v45, 0.0  ;;  %v421_v48 = vpop.f32.mrb[29].mxu1  ;;  %v456_v52 = vmax.f32 %v339_v44, 0.0 }
 0x13d   :  { %v343_v49 = vpop.f32.mrb[30].mxu0  ;;  %v489_v50 = vmax.f32 %v421_v48, 0.0  ;;  %v423_v51 = vpop.f32.mrb[30].mxu1  ;;  %v457_v58 = vmax.f32 %v341_v46, 0.0 }
 0x13e   :  { %v458_v53 = vmax.f32 %v343_v49, 0.0  ;;  %v345_v54 = vpop.f32.mrb[31].mxu0  ;;  %v490_v55 = vmax.f32 %v423_v51, 0.0  ;;  %v425_v56 = vpop.f32.mrb[31].mxu1 }
 0x13f   :  { %v459_v62 = vmax.f32 %v345_v54, 0.0  ;;  %v491_v63 = vmax.f32 %v425_v56, 0.0 }
 0x140   :  { %v506_v0 = vpack.c.bf16 %v458_v53, %v456_v52  ;;  %v522_v1 = vpack.c.bf16 %v490_v55, %v488_v47 }
 0x141   :  { %v507_v2 = vpack.c.bf16 %v459_v62, %v457_v58  ;;  %v523_v3 = vpack.c.bf16 %v491_v63, %v489_v50 }
 0x143   :  { %730 = vmatprep.subr.bf16.mxu1 %v507_v2 }
 0x144   :  { %731 = vmatpush1.bf16.msra.mxu1 %v506_v0 }
 0x145   :  { %732 = vmatprep.subr.bf16.mxu1 %v1995_v41  ;;  %v1690_v41 = vld [vmem:[#allocation2 + $0x14] ss:$8 sps:$4 sm:$0xff]  }
 0x148   :  { %733 = vmatpush1.bf16.msra.mxu1 %v1993_v39  ;;  %v1687_v39 = vld [vmem:[#allocation2] ss:$8 sps:$4 sm:$0xff]  }
 0x149   :  { %734 = vmatprep.subr.bf16.mxu1 %v1999_v61  ;;  %v1693_v61 = vld [vmem:[#allocation2 + $0x24] ss:$8 sps:$4 sm:$0xff]  }
 0x14c   :  { %735 = vmatpush1.bf16.msra.mxu1 %v1997_v59  ;;  %v1692_v59 = vld [vmem:[#allocation2 + $0x10] ss:$8 sps:$4 sm:$0xff]  }
 0x14d   :  { %736 = vmatprep.subr.bf16.mxu1 %v2003_v17  ;;  %v1696_v17 = vld [vmem:[#allocation2 + $0x34] ss:$8 sps:$4 sm:$0xff]  }
 0x150   :  { %737 = vmatpush1.bf16.msra.mxu1 %v2001_v15  ;;  %v1695_v15 = vld [vmem:[#allocation2 + $0x20] ss:$8 sps:$4 sm:$0xff]  }
 0x151   :  { %738 = vmatprep.subr.bf16.mxu1 %v2007_v37  ;;  %v1699_v37 = vld [vmem:[#allocation2 + $0x44] ss:$8 sps:$4 sm:$0xff]  }
 0x154   :  { %739 = vmatpush1.bf16.msra.mxu1 %v2005_v35  ;;  %v1698_v35 = vld [vmem:[#allocation2 + $0x30] ss:$8 sps:$4 sm:$0xff]  }
 0x155   :  { %740 = vmatprep.subr.bf16.mxu1 %v2011_v60  ;;  %v1702_v60 = vld [vmem:[#allocation2 + $0x54] ss:$8 sps:$4 sm:$0xff]  }
 0x158   :  { %741 = vmatpush1.bf16.msra.mxu1 %v2009_v57  ;;  %v1701_v57 = vld [vmem:[#allocation2 + $0x40] ss:$8 sps:$4 sm:$0xff]  }
 0x159   :  { %742 = vmatprep.subr.bf16.mxu1 %v519_v19  ;;  %v1723_v19 = vld [vmem:[#allocation2 + $0xc4] ss:$8 sps:$4 sm:$0xff]  }
 0x15c   :  { %743 = vmatpush1.bf16.msra.mxu1 %v518_v16  ;;  %v1720_v16 = vld [vmem:[#allocation2 + $0xb4] ss:$8 sps:$4 sm:$0xff]  }
 0x15d   :  { %744 = vmatprep.subr.bf16.mxu1 %v521_v43 }
 0x160   :  { %745 = vmatpush1.bf16.msra.mxu1 %v520_v40 }
 0x161   :  { %746 = vmatprep.subr.bf16.mxu1 %v523_v3 }
 0x164   :  { %747 = vmatpush1.bf16.msra.mxu1 %v522_v1 }
 0x167   :  { %749 = vmatmul.mubr.bf16.vlgmr.msra.gmra.mrb[32].mxu1 %v1687_v39 }
 0x168   :  { %758 = vmatprep.mubr.bf16.mxu1 %v1690_v41 }
 0x16f   :  { %759 = vmatmul.mubr.bf16.gmra.mrb[36].mxu1 %v1692_v59 }
 0x170   :  { %768 = vmatprep.mubr.bf16.mxu1 %v1693_v61 }
 0x177   :  { %769 = vmatmul.mubr.bf16.gmra.mrb[40].mxu1 %v1695_v15 }
 0x178   :  { %778 = vmatprep.mubr.bf16.mxu1 %v1696_v17 }
 0x17f   :  { %779 = vmatmul.mubr.bf16.gmra.mrb[44].mxu1 %v1698_v35 }
 0x180   :  { %788 = vmatprep.mubr.bf16.mxu1 %v1699_v37 }
 0x187   :  { %789 = vmatmul.mubr.bf16.gmra.mrb[48].mxu1 %v1701_v57 }
 0x188   :  { %798 = vmatprep.mubr.bf16.mxu1 %v1702_v60 }
 0x18f   :  { %799 = vmatmul.mubr.bf16.gmra.mrb[52].mxu1 %v1704_v4 }
 0x190   :  { %808 = vmatprep.mubr.bf16.mxu1 %v1705_v5 }
 0x197   :  { %809 = vmatmul.mubr.bf16.gmra.mrb[56].mxu1 %v1707_v6 }
 0x198   :  { %818 = vmatprep.mubr.bf16.mxu1 %v1708_v7 }
 0x19f   :  { %819 = vmatmul.mubr.bf16.gmra.mrb[60].mxu1 %v1710_v8 }
 0x1a0   :  { %828 = vmatprep.mubr.bf16.mxu1 %v1711_v9 }
 0x1a7   :  { %829 = vmatmul.mubr.bf16.gmra.mrb[64].mxu1 %v1713_v10 }
 0x1a8   :  { %838 = vmatprep.mubr.bf16.mxu1 %v1714_v11 }
 0x1af   :  { %839 = vmatmul.mubr.bf16.gmra.mrb[68].mxu1 %v1716_v12 }
 0x1b0   :  { %848 = vmatprep.mubr.bf16.mxu1 %v1717_v13 }
 0x1b7   :  { %849 = vmatmul.mubr.bf16.gmra.mrb[72].mxu1 %v1719_v14 }
 0x1b8   :  { %858 = vmatprep.mubr.bf16.mxu1 %v1720_v16 }
 0x1bf   :  { %859 = vmatmul.mubr.bf16.gmra.mrb[76].mxu1 %v1722_v18 }
 0x1c0   :  { %868 = vmatprep.mubr.bf16.mxu1 %v1723_v19 }
 0x1c7   :  { %869 = vmatmul.mubr.bf16.gmra.mrb[80].mxu1 %v1725_v20 }
 0x1c8   :  { %878 = vmatprep.mubr.bf16.mxu1 %v1726_v21 }
 0x1cf   :  { %879 = vmatmul.mubr.bf16.gmra.mrb[84].mxu1 %v1728_v22 }
 0x1d0   :  { %888 = vmatprep.mubr.bf16.mxu1 %v1729_v23 }
 0x1d7   :  { %889 = vmatmul.mubr.bf16.gmra.mrb[88].mxu1 %v1731_v24 }
 0x1d8   :  { %898 = vmatprep.mubr.bf16.mxu1 %v1732_v25 }
 0x1df   :  { %899 = vmatmul.mubr.bf16.gmra.mrb[92].mxu1 %v1734_v26 }
 0x23a   :  { %v750_v27 = vpop.f32.mrb[32].mxu1 }
 0x23b   :  { %v752_v28 = vpop.f32.mrb[33].mxu1  ;;  %v909_v31 = vmax.f32 %v750_v27, 0.0 }
 0x23c   :  { %v754_v30 = vpop.f32.mrb[34].mxu1  ;;  %v910_v34 = vmax.f32 %v752_v28, 0.0 }
 0x23d   :  { %v911_v32 = vmax.f32 %v754_v30, 0.0  ;;  %v756_v33 = vpop.f32.mrb[35].mxu1 }
 0x23e   :  { %v912_v36 = vmax.f32 %v756_v33, 0.0 }
 0x23f   :  { %v973_v38 = vpack.c.bf16 %v911_v32, %v909_v31 }
 0x240   :  { %v974_v40 = vpack.c.bf16 %v912_v36, %v910_v34 }
 0x242   :  { %v760_v42 = vpop.f32.mrb[36].mxu1  ;;  %1197 = vmatprep.subr.bf16.mxu0 %v974_v40 }
 0x243   :  { %v762_v43 = vpop.f32.mrb[37].mxu1  ;;  %1198 = vmatpush1.bf16.msra.mxu0 %v973_v38  ;;  %v913_v45 = vmax.f32 %v760_v42, 0.0 }
 0x244   :  { %v764_v44 = vpop.f32.mrb[38].mxu1  ;;  %v914_v48 = vmax.f32 %v762_v43, 0.0 }
 0x245   :  { %v915_v46 = vmax.f32 %v764_v44, 0.0  ;;  %v766_v47 = vpop.f32.mrb[39].mxu1 }
 0x246   :  { %v916_v49 = vmax.f32 %v766_v47, 0.0 }
 0x247   :  { %v975_v50 = vpack.c.bf16 %v915_v46, %v913_v45 }
 0x248   :  { %v976_v51 = vpack.c.bf16 %v916_v49, %v914_v48 }
 0x24a   :  { %v770_v52 = vpop.f32.mrb[40].mxu1  ;;  %1199 = vmatprep.subr.bf16.mxu0 %v976_v51 }
 0x24b   :  { %v772_v53 = vpop.f32.mrb[41].mxu1  ;;  %1200 = vmatpush1.bf16.msra.mxu0 %v975_v50  ;;  %v917_v55 = vmax.f32 %v770_v52, 0.0 }
 0x24c   :  { %v774_v54 = vpop.f32.mrb[42].mxu1  ;;  %v918_v62 = vmax.f32 %v772_v53, 0.0 }
 0x24d   :  { %v919_v56 = vmax.f32 %v774_v54, 0.0  ;;  %v776_v58 = vpop.f32.mrb[43].mxu1 }
 0x24e   :  { %v920_v63 = vmax.f32 %v776_v58, 0.0 }
 0x24f   :  { %v977_v0 = vpack.c.bf16 %v919_v56, %v917_v55 }
 0x250   :  { %v978_v1 = vpack.c.bf16 %v920_v63, %v918_v62 }
 0x252   :  { %v780_v2 = vpop.f32.mrb[44].mxu1  ;;  %1201 = vmatprep.subr.bf16.mxu0 %v978_v1 }
 0x253   :  { %v782_v3 = vpop.f32.mrb[45].mxu1  ;;  %1202 = vmatpush1.bf16.msra.mxu0 %v977_v0  ;;  %v921_v41 = vmax.f32 %v780_v2, 0.0 }
 0x254   :  { %v784_v39 = vpop.f32.mrb[46].mxu1  ;;  %v922_v15 = vmax.f32 %v782_v3, 0.0 }
 0x255   :  { %v923_v59 = vmax.f32 %v784_v39, 0.0  ;;  %v786_v61 = vpop.f32.mrb[47].mxu1 }
 0x256   :  { %v924_v17 = vmax.f32 %v786_v61, 0.0 }
 0x257   :  { %v979_v35 = vpack.c.bf16 %v923_v59, %v921_v41 }
 0x258   :  { %v980_v37 = vpack.c.bf16 %v924_v17, %v922_v15 }
 0x25a   :  { %v790_v57 = vpop.f32.mrb[48].mxu1  ;;  %1203 = vmatprep.subr.bf16.mxu0 %v980_v37 }
 0x25b   :  { %v792_v60 = vpop.f32.mrb[49].mxu1  ;;  %1204 = vmatpush1.bf16.msra.mxu0 %v979_v35  ;;  %v925_v5 = vmax.f32 %v790_v57, 0.0 }
 0x25c   :  { %v794_v4 = vpop.f32.mrb[50].mxu1  ;;  %v926_v8 = vmax.f32 %v792_v60, 0.0 }
 0x25d   :  { %v927_v6 = vmax.f32 %v794_v4, 0.0  ;;  %v796_v7 = vpop.f32.mrb[51].mxu1 }
 0x25e   :  { %v928_v9 = vmax.f32 %v796_v7, 0.0 }
 0x25f   :  { %v981_v10 = vpack.c.bf16 %v927_v6, %v925_v5 }
 0x260   :  { %v982_v11 = vpack.c.bf16 %v928_v9, %v926_v8 }
 0x262   :  { %v800_v12 = vpop.f32.mrb[52].mxu1  ;;  %1205 = vmatprep.subr.bf16.mxu0 %v982_v11 }
 0x263   :  { %v802_v13 = vpop.f32.mrb[53].mxu1  ;;  %1206 = vmatpush1.bf16.msra.mxu0 %v981_v10  ;;  %v929_v16 = vmax.f32 %v800_v12, 0.0 }
 0x264   :  { %v804_v14 = vpop.f32.mrb[54].mxu1  ;;  %v930_v20 = vmax.f32 %v802_v13, 0.0 }
 0x265   :  { %v931_v18 = vmax.f32 %v804_v14, 0.0  ;;  %v806_v19 = vpop.f32.mrb[55].mxu1 }
 0x266   :  { %v932_v21 = vmax.f32 %v806_v19, 0.0 }
 0x267   :  { %v983_v22 = vpack.c.bf16 %v931_v18, %v929_v16 }
 0x268   :  { %v984_v23 = vpack.c.bf16 %v932_v21, %v930_v20 }
 0x26a   :  { %v810_v24 = vpop.f32.mrb[56].mxu1  ;;  %1207 = vmatprep.subr.bf16.mxu0 %v984_v23 }
 0x26b   :  { %v812_v25 = vpop.f32.mrb[57].mxu1  ;;  %1208 = vmatpush1.bf16.msra.mxu0 %v983_v22  ;;  %v933_v27 = vmax.f32 %v810_v24, 0.0 }
 0x26c   :  { %v814_v26 = vpop.f32.mrb[58].mxu1  ;;  %v934_v30 = vmax.f32 %v812_v25, 0.0 }
 0x26d   :  { %v935_v28 = vmax.f32 %v814_v26, 0.0  ;;  %v816_v29 = vpop.f32.mrb[59].mxu1 }
 0x26e   :  { %v936_v31 = vmax.f32 %v816_v29, 0.0 }
 0x26f   :  { %v985_v32 = vpack.c.bf16 %v935_v28, %v933_v27 }
 0x270   :  { %v986_v33 = vpack.c.bf16 %v936_v31, %v934_v30 }
 0x272   :  { %v820_v34 = vpop.f32.mrb[60].mxu1  ;;  %1209 = vmatprep.subr.bf16.mxu0 %v986_v33 }
 0x273   :  { %v822_v36 = vpop.f32.mrb[61].mxu1  ;;  %1210 = vmatpush1.bf16.msra.mxu0 %v985_v32  ;;  %v937_v40 = vmax.f32 %v820_v34, 0.0 }
 0x274   :  { %v824_v38 = vpop.f32.mrb[62].mxu1  ;;  %v938_v44 = vmax.f32 %v822_v36, 0.0 }
 0x275   :  { %v939_v42 = vmax.f32 %v824_v38, 0.0  ;;  %v826_v43 = vpop.f32.mrb[63].mxu1 }
 0x276   :  { %v940_v45 = vmax.f32 %v826_v43, 0.0 }
 0x277   :  { %v987_v46 = vpack.c.bf16 %v939_v42, %v937_v40 }
 0x278   :  { %v988_v47 = vpack.c.bf16 %v940_v45, %v938_v44 }
 0x27a   :  { %v830_v48 = vpop.f32.mrb[64].mxu1  ;;  %1211 = vmatprep.subr.bf16.mxu0 %v988_v47 }
 0x27b   :  { %v832_v49 = vpop.f32.mrb[65].mxu1  ;;  %1212 = vmatpush1.bf16.msra.mxu0 %v987_v46  ;;  %v941_v51 = vmax.f32 %v830_v48, 0.0 }
 0x27c   :  { %v834_v50 = vpop.f32.mrb[66].mxu1  ;;  %v942_v54 = vmax.f32 %v832_v49, 0.0 }
 0x27d   :  { %v943_v52 = vmax.f32 %v834_v50, 0.0  ;;  %v836_v53 = vpop.f32.mrb[67].mxu1 }
 0x27e   :  { %v944_v55 = vmax.f32 %v836_v53, 0.0 }
 0x27f   :  { %v989_v56 = vpack.c.bf16 %v943_v52, %v941_v51 }
 0x280   :  { %v990_v58 = vpack.c.bf16 %v944_v55, %v942_v54 }
 0x282   :  { %v840_v62 = vpop.f32.mrb[68].mxu1  ;;  %1213 = vmatprep.subr.bf16.mxu0 %v990_v58 }
 0x283   :  { %v842_v63 = vpop.f32.mrb[69].mxu1  ;;  %1214 = vmatpush1.bf16.msra.mxu0 %v989_v56  ;;  %v945_v1 = vmax.f32 %v840_v62, 0.0 }
 0x284   :  { %v844_v0 = vpop.f32.mrb[70].mxu1  ;;  %v946_v39 = vmax.f32 %v842_v63, 0.0 }
 0x285   :  { %v947_v2 = vmax.f32 %v844_v0, 0.0  ;;  %v846_v3 = vpop.f32.mrb[71].mxu1 }
 0x286   :  { %v948_v41 = vmax.f32 %v846_v3, 0.0 }
 0x287   :  { %v991_v59 = vpack.c.bf16 %v947_v2, %v945_v1 }
 0x288   :  { %v992_v61 = vpack.c.bf16 %v948_v41, %v946_v39  ;;  %v1735_v39 = vld [vmem:[#allocation5] ss:$8 sps:$4 sm:$0xff]   ;;  %v1738_v41 = vld [vmem:[#allocation5 + $0x14] ss:$8 sps:$4 sm:$0xff]  }
 0x28a   :  { %v850_v15 = vpop.f32.mrb[72].mxu1  ;;  %1215 = vmatprep.subr.bf16.mxu0 %v992_v61  ;;  %v1741_v61 = vld [vmem:[#allocation5 + $0x24] ss:$8 sps:$4 sm:$0xff]  }
 0x28b   :  { %v852_v17 = vpop.f32.mrb[73].mxu1  ;;  %1216 = vmatpush1.bf16.msra.mxu0 %v991_v59  ;;  %v949_v37 = vmax.f32 %v850_v15, 0.0  ;;  %v1740_v59 = vld [vmem:[#allocation5 + $0x10] ss:$8 sps:$4 sm:$0xff]   ;;  %v1743_v15 = vld [vmem:[#allocation5 + $0x20] ss:$8 sps:$4 sm:$0xff]  }
 0x28c   :  { %v854_v35 = vpop.f32.mrb[74].mxu1  ;;  %v950_v4 = vmax.f32 %v852_v17, 0.0  ;;  %v1744_v17 = vld [vmem:[#allocation5 + $0x34] ss:$8 sps:$4 sm:$0xff]  }
 0x28d   :  { %v951_v57 = vmax.f32 %v854_v35, 0.0  ;;  %v856_v60 = vpop.f32.mrb[75].mxu1  ;;  %v1746_v35 = vld [vmem:[#allocation5 + $0x30] ss:$8 sps:$4 sm:$0xff]  }
 0x28e   :  { %v952_v5 = vmax.f32 %v856_v60, 0.0  ;;  %v1750_v60 = vld [vmem:[#allocation5 + $0x54] ss:$8 sps:$4 sm:$0xff]  }
 0x28f   :  { %v993_v6 = vpack.c.bf16 %v951_v57, %v949_v37  ;;  %v1747_v37 = vld [vmem:[#allocation5 + $0x44] ss:$8 sps:$4 sm:$0xff]   ;;  %v1749_v57 = vld [vmem:[#allocation5 + $0x40] ss:$8 sps:$4 sm:$0xff]  }
 0x290   :  { %v994_v7 = vpack.c.bf16 %v952_v5, %v950_v4  ;;  %v1752_v4 = vld [vmem:[#allocation5 + $0x50] ss:$8 sps:$4 sm:$0xff]   ;;  %v1753_v5 = vld [vmem:[#allocation5 + $0x64] ss:$8 sps:$4 sm:$0xff]  }
 0x292   :  { %v860_v8 = vpop.f32.mrb[76].mxu1  ;;  %1217 = vmatprep.subr.bf16.mxu0 %v994_v7  ;;  %v1756_v7 = vld [vmem:[#allocation5 + $0x74] ss:$8 sps:$4 sm:$0xff]  }
 0x293   :  { %v862_v9 = vpop.f32.mrb[77].mxu1  ;;  %1218 = vmatpush1.bf16.msra.mxu0 %v993_v6  ;;  %v953_v11 = vmax.f32 %v860_v8, 0.0  ;;  %v1755_v6 = vld [vmem:[#allocation5 + $0x60] ss:$8 sps:$4 sm:$0xff]   ;;  %v1758_v8 = vld [vmem:[#allocation5 + $0x70] ss:$8 sps:$4 sm:$0xff]  }
 0x294   :  { %v864_v10 = vpop.f32.mrb[78].mxu1  ;;  %v954_v14 = vmax.f32 %v862_v9, 0.0  ;;  %v1759_v9 = vld [vmem:[#allocation5 + $0x84] ss:$8 sps:$4 sm:$0xff]  }
 0x295   :  { %v955_v12 = vmax.f32 %v864_v10, 0.0  ;;  %v866_v13 = vpop.f32.mrb[79].mxu1  ;;  %v1761_v10 = vld [vmem:[#allocation5 + $0x80] ss:$8 sps:$4 sm:$0xff]  }
 0x296   :  { %v956_v16 = vmax.f32 %v866_v13, 0.0  ;;  %v1765_v13 = vld [vmem:[#allocation5 + $0xa4] ss:$8 sps:$4 sm:$0xff]  }
 0x297   :  { %v995_v18 = vpack.c.bf16 %v955_v12, %v953_v11  ;;  %v1762_v11 = vld [vmem:[#allocation5 + $0x94] ss:$8 sps:$4 sm:$0xff]   ;;  %v1764_v12 = vld [vmem:[#allocation5 + $0x90] ss:$8 sps:$4 sm:$0xff]  }
 0x298   :  { %v996_v19 = vpack.c.bf16 %v956_v16, %v954_v14  ;;  %v1767_v14 = vld [vmem:[#allocation5 + $0xa0] ss:$8 sps:$4 sm:$0xff]   ;;  %v1768_v16 = vld [vmem:[#allocation5 + $0xb4] ss:$8 sps:$4 sm:$0xff]  }
 0x29a   :  { %v870_v20 = vpop.f32.mrb[80].mxu1  ;;  %1219 = vmatprep.subr.bf16.mxu0 %v996_v19  ;;  %v1771_v19 = vld [vmem:[#allocation5 + $0xc4] ss:$8 sps:$4 sm:$0xff]  }
 0x29b   :  { %v872_v21 = vpop.f32.mrb[81].mxu1  ;;  %1220 = vmatpush1.bf16.msra.mxu0 %v995_v18  ;;  %v957_v23 = vmax.f32 %v870_v20, 0.0  ;;  %v1770_v18 = vld [vmem:[#allocation5 + $0xb0] ss:$8 sps:$4 sm:$0xff]   ;;  %v1773_v20 = vld [vmem:[#allocation5 + $0xc0] ss:$8 sps:$4 sm:$0xff]  }
 0x29c   :  { %v874_v22 = vpop.f32.mrb[82].mxu1  ;;  %v958_v26 = vmax.f32 %v872_v21, 0.0  ;;  %v1774_v21 = vld [vmem:[#allocation5 + $0xd4] ss:$8 sps:$4 sm:$0xff]  }
 0x29d   :  { %v959_v24 = vmax.f32 %v874_v22, 0.0  ;;  %v876_v25 = vpop.f32.mrb[83].mxu1  ;;  %v1776_v22 = vld [vmem:[#allocation5 + $0xd0] ss:$8 sps:$4 sm:$0xff]  }
 0x29e   :  { %v960_v27 = vmax.f32 %v876_v25, 0.0  ;;  %v1780_v25 = vld [vmem:[#allocation5 + $0xf4] ss:$8 sps:$4 sm:$0xff]  }
 0x29f   :  { %v997_v28 = vpack.c.bf16 %v959_v24, %v957_v23  ;;  %v1777_v23 = vld [vmem:[#allocation5 + $0xe4] ss:$8 sps:$4 sm:$0xff]   ;;  %v1779_v24 = vld [vmem:[#allocation5 + $0xe0] ss:$8 sps:$4 sm:$0xff]  }
 0x2a0   :  { %v998_v29 = vpack.c.bf16 %v960_v27, %v958_v26  ;;  %v1782_v26 = vld [vmem:[#allocation5 + $0xf0] ss:$8 sps:$4 sm:$0xff]  }
 0x2a2   :  { %v880_v30 = vpop.f32.mrb[84].mxu1  ;;  %1221 = vmatprep.subr.bf16.mxu0 %v998_v29 }
 0x2a3   :  { %v882_v31 = vpop.f32.mrb[85].mxu1  ;;  %1222 = vmatpush1.bf16.msra.mxu0 %v997_v28  ;;  %v961_v33 = vmax.f32 %v880_v30, 0.0  ;;  %v2026_v28 = vld [vmem:[%s2048_s4] sm:$0xff]  ;;  %s1862_s4 = smov [#allocation7]  }
 0x2a4   :  { %v884_v32 = vpop.f32.mrb[86].mxu1  ;;  %v962_v38 = vmax.f32 %v882_v31, 0.0  ;;  %v1654_v30 = vcombine.high %v2026_v28, %v2026_v28  ;;  %s1543_s29 = sshll.u32 %s1862_s4, 4  ;;  %s1544_s29 = int_to_ptr.vmem [resolvable:$true] %s1543_s29 }
 0x2a5   :  { %v963_v34 = vmax.f32 %v884_v32, 0.0  ;;  %v886_v36 = vpop.f32.mrb[87].mxu1  ;;  %s1829_s30 = scalar_lea.vmem %s1544_s29, 256  ;;  %p1834_p3 = scmp.lt.s32.totalorder %s1544_s29, %s1544_s29 }
 0x2a6   :  { %v964_v40 = vmax.f32 %v886_v36, 0.0  ;;  %1526 = vmatprep.mubr.bf16.mxu1 %v1654_v30  ;;  %p1830_p2 = scmp.ne.s32.totalorder %s1544_s29, %s1829_s30  ;;  %p1835_p4 = scmp.lt.s32.totalorder %s1829_s30, %s1829_s30 }
 0x2a7   :  { %v999_v42 = vpack.c.bf16 %v963_v34, %v961_v33 }
 0x2a8   :  { %v1000_v43 = vpack.c.bf16 %v964_v40, %v962_v38  ;;  %p1836_p5 = por %p1835_p4, %p1834_p3 }
 0x2aa   :  { %v890_v44 = vpop.f32.mrb[88].mxu1  ;;  %1223 = vmatprep.subr.bf16.mxu0 %v1000_v43  ;;  %p1837_p6 = pnand %p1836_p5, %p1830_p2 }
 0x2ab   :  { %v892_v45 = vpop.f32.mrb[89].mxu1  ;;  %1224 = vmatpush1.bf16.msra.mxu0 %v999_v42  ;;  %v965_v47 = vmax.f32 %v890_v44, 0.0 }
 0x2ac   :  { %v894_v46 = vpop.f32.mrb[90].mxu1  ;;  %v966_v50 = vmax.f32 %v892_v45, 0.0 }
 0x2ad   :  { %v967_v48 = vmax.f32 %v894_v46, 0.0  ;;  %v896_v49 = vpop.f32.mrb[91].mxu1 }
 0x2ae   :  { %v968_v51 = vmax.f32 %v896_v49, 0.0 }
 0x2af   :  { %v1001_v52 = vpack.c.bf16 %v967_v48, %v965_v47 }
 0x2b0   :  { %v1002_v53 = vpack.c.bf16 %v968_v51, %v966_v50 }
 0x2b2   :  { %v900_v54 = vpop.f32.mrb[92].mxu1  ;;  %1225 = vmatprep.subr.bf16.mxu0 %v1002_v53 }
 0x2b3   :  { %v902_v55 = vpop.f32.mrb[93].mxu1  ;;  %1226 = vmatpush1.bf16.msra.mxu0 %v1001_v52  ;;  %v969_v58 = vmax.f32 %v900_v54, 0.0 }
 0x2b4   :  { %v904_v56 = vpop.f32.mrb[94].mxu1  ;;  %v970_v0 = vmax.f32 %v902_v55, 0.0 }
 0x2b5   :  { %v971_v62 = vmax.f32 %v904_v56, 0.0  ;;  %v906_v63 = vpop.f32.mrb[95].mxu1 }
 0x2b6   :  { %v972_v1 = vmax.f32 %v906_v63, 0.0 }
 0x2b7   :  { %v1003_v2 = vpack.c.bf16 %v971_v62, %v969_v58 }
 0x2b8   :  { %v1004_v3 = vpack.c.bf16 %v972_v1, %v970_v0 }
 0x2ba   :  { %1227 = vmatprep.subr.bf16.mxu0 %v1004_v3 }
 0x2bb   :  { %1228 = vmatpush1.bf16.msra.mxu0 %v1003_v2 }
 0x2be   :  { %1230 = vmatmul.mubr.bf16.vlgmr.msra.gmra.mrb[32].mxu0 %v1735_v39 }
 0x2bf   :  { %1239 = vmatprep.mubr.bf16.mxu0 %v1738_v41 }
 0x2c6   :  { %1240 = vmatmul.mubr.bf16.gmra.mrb[36].mxu0 %v1740_v59 }
 0x2c7   :  { %1249 = vmatprep.mubr.bf16.mxu0 %v1741_v61 }
 0x2ce   :  { %1250 = vmatmul.mubr.bf16.gmra.mrb[40].mxu0 %v1743_v15 }
 0x2cf   :  { %1259 = vmatprep.mubr.bf16.mxu0 %v1744_v17 }
 0x2d6   :  { %1260 = vmatmul.mubr.bf16.gmra.mrb[44].mxu0 %v1746_v35 }
 0x2d7   :  { %1269 = vmatprep.mubr.bf16.mxu0 %v1747_v37 }
 0x2de   :  { %1270 = vmatmul.mubr.bf16.gmra.mrb[48].mxu0 %v1749_v57 }
 0x2df   :  { %1279 = vmatprep.mubr.bf16.mxu0 %v1750_v60 }
 0x2e6   :  { %1280 = vmatmul.mubr.bf16.gmra.mrb[52].mxu0 %v1752_v4 }
 0x2e7   :  { %1289 = vmatprep.mubr.bf16.mxu0 %v1753_v5 }
 0x2ee   :  { %1290 = vmatmul.mubr.bf16.gmra.mrb[56].mxu0 %v1755_v6 }
 0x2ef   :  { %1299 = vmatprep.mubr.bf16.mxu0 %v1756_v7 }
 0x2f6   :  { %1300 = vmatmul.mubr.bf16.gmra.mrb[60].mxu0 %v1758_v8 }
 0x2f7   :  { %1309 = vmatprep.mubr.bf16.mxu0 %v1759_v9 }
 0x2fe   :  { %1310 = vmatmul.mubr.bf16.gmra.mrb[64].mxu0 %v1761_v10 }
 0x2ff   :  { %1319 = vmatprep.mubr.bf16.mxu0 %v1762_v11 }
 0x306   :  { %1320 = vmatmul.mubr.bf16.gmra.mrb[68].mxu0 %v1764_v12 }
 0x307   :  { %1329 = vmatprep.mubr.bf16.mxu0 %v1765_v13 }
 0x30e   :  { %1330 = vmatmul.mubr.bf16.gmra.mrb[72].mxu0 %v1767_v14 }
 0x30f   :  { %1339 = vmatprep.mubr.bf16.mxu0 %v1768_v16 }
 0x316   :  { %1340 = vmatmul.mubr.bf16.gmra.mrb[76].mxu0 %v1770_v18 }
 0x317   :  { %1349 = vmatprep.mubr.bf16.mxu0 %v1771_v19 }
 0x31e   :  { %1350 = vmatmul.mubr.bf16.gmra.mrb[80].mxu0 %v1773_v20 }
 0x31f   :  { %1359 = vmatprep.mubr.bf16.mxu0 %v1774_v21 }
 0x326   :  { %1360 = vmatmul.mubr.bf16.gmra.mrb[84].mxu0 %v1776_v22 }
 0x327   :  { %1369 = vmatprep.mubr.bf16.mxu0 %v1777_v23 }
 0x32e   :  { %1370 = vmatmul.mubr.bf16.gmra.mrb[88].mxu0 %v1779_v24 }
 0x32f   :  { %1379 = vmatprep.mubr.bf16.mxu0 %v1780_v25 }
 0x336   :  { %1380 = vmatmul.mubr.bf16.gmra.mrb[92].mxu0 %v1782_v26 }
 0x391   :  { %v1231_v27 = vpop.f32.mrb[32].mxu0 }
 0x392   :  { %v1233_v29 = vpop.f32.mrb[33].mxu0  ;;  %v1390_v32 = vmax.f32 %v1231_v27, 0.0 }
 0x393   :  { %v1235_v31 = vpop.f32.mrb[34].mxu0  ;;  %v1391_v36 = vmax.f32 %v1233_v29, 0.0 }
 0x394   :  { %v1392_v33 = vmax.f32 %v1235_v31, 0.0  ;;  %v1237_v34 = vpop.f32.mrb[35].mxu0 }
 0x395   :  { %v1393_v38 = vmax.f32 %v1237_v34, 0.0 }
 0x396   :  { %v1454_v40 = vpack.c.bf16 %v1392_v33, %v1390_v32 }
 0x397   :  { %v1455_v42 = vpack.c.bf16 %v1393_v38, %v1391_v36 }
 0x399   :  { %v1241_v43 = vpop.f32.mrb[36].mxu0  ;;  %1494 = vmatprep.subr.bf16.mxu1 %v1455_v42 }
 0x39a   :  { %v1243_v44 = vpop.f32.mrb[37].mxu0  ;;  %1495 = vmatpush1.bf16.msra.mxu1 %v1454_v40  ;;  %v1394_v46 = vmax.f32 %v1241_v43, 0.0 }
 0x39b   :  { %v1245_v45 = vpop.f32.mrb[38].mxu0  ;;  %v1395_v49 = vmax.f32 %v1243_v44, 0.0 }
 0x39c   :  { %v1396_v47 = vmax.f32 %v1245_v45, 0.0  ;;  %v1247_v48 = vpop.f32.mrb[39].mxu0 }
 0x39d   :  { %v1397_v50 = vmax.f32 %v1247_v48, 0.0 }
 0x39e   :  { %v1456_v51 = vpack.c.bf16 %v1396_v47, %v1394_v46 }
 0x39f   :  { %v1457_v52 = vpack.c.bf16 %v1397_v50, %v1395_v49 }
 0x3a1   :  { %v1251_v53 = vpop.f32.mrb[40].mxu0  ;;  %1496 = vmatprep.subr.bf16.mxu1 %v1457_v52 }
 0x3a2   :  { %v1253_v54 = vpop.f32.mrb[41].mxu0  ;;  %1497 = vmatpush1.bf16.msra.mxu1 %v1456_v51  ;;  %v1398_v56 = vmax.f32 %v1251_v53, 0.0 }
 0x3a3   :  { %v1255_v55 = vpop.f32.mrb[42].mxu0  ;;  %v1399_v63 = vmax.f32 %v1253_v54, 0.0 }
 0x3a4   :  { %v1400_v58 = vmax.f32 %v1255_v55, 0.0  ;;  %v1257_v62 = vpop.f32.mrb[43].mxu0 }
 0x3a5   :  { %v1401_v0 = vmax.f32 %v1257_v62, 0.0 }
 0x3a6   :  { %v1458_v1 = vpack.c.bf16 %v1400_v58, %v1398_v56 }
 0x3a7   :  { %v1459_v2 = vpack.c.bf16 %v1401_v0, %v1399_v63 }
 0x3a9   :  { %v1261_v3 = vpop.f32.mrb[44].mxu0  ;;  %1498 = vmatprep.subr.bf16.mxu1 %v1459_v2 }
 0x3aa   :  { %v1263_v39 = vpop.f32.mrb[45].mxu0  ;;  %1499 = vmatpush1.bf16.msra.mxu1 %v1458_v1  ;;  %v1402_v59 = vmax.f32 %v1261_v3, 0.0 }
 0x3ab   :  { %v1265_v41 = vpop.f32.mrb[46].mxu0  ;;  %v1403_v17 = vmax.f32 %v1263_v39, 0.0 }
 0x3ac   :  { %v1404_v61 = vmax.f32 %v1265_v41, 0.0  ;;  %v1267_v15 = vpop.f32.mrb[47].mxu0 }
 0x3ad   :  { %v1405_v35 = vmax.f32 %v1267_v15, 0.0 }
 0x3ae   :  { %v1460_v37 = vpack.c.bf16 %v1404_v61, %v1402_v59 }
 0x3af   :  { %v1461_v57 = vpack.c.bf16 %v1405_v35, %v1403_v17 }
 0x3b1   :  { %v1271_v60 = vpop.f32.mrb[48].mxu0  ;;  %1500 = vmatprep.subr.bf16.mxu1 %v1461_v57 }
 0x3b2   :  { %v1273_v4 = vpop.f32.mrb[49].mxu0  ;;  %1501 = vmatpush1.bf16.msra.mxu1 %v1460_v37  ;;  %v1406_v6 = vmax.f32 %v1271_v60, 0.0 }
 0x3b3   :  { %v1275_v5 = vpop.f32.mrb[50].mxu0  ;;  %v1407_v9 = vmax.f32 %v1273_v4, 0.0 }
 0x3b4   :  { %v1408_v7 = vmax.f32 %v1275_v5, 0.0  ;;  %v1277_v8 = vpop.f32.mrb[51].mxu0 }
 0x3b5   :  { %v1409_v10 = vmax.f32 %v1277_v8, 0.0 }
 0x3b6   :  { %v1462_v11 = vpack.c.bf16 %v1408_v7, %v1406_v6 }
 0x3b7   :  { %v1463_v12 = vpack.c.bf16 %v1409_v10, %v1407_v9 }
 0x3b9   :  { %v1281_v13 = vpop.f32.mrb[52].mxu0  ;;  %1502 = vmatprep.subr.bf16.mxu1 %v1463_v12 }
 0x3ba   :  { %v1283_v14 = vpop.f32.mrb[53].mxu0  ;;  %1503 = vmatpush1.bf16.msra.mxu1 %v1462_v11  ;;  %v1410_v18 = vmax.f32 %v1281_v13, 0.0 }
 0x3bb   :  { %v1285_v16 = vpop.f32.mrb[54].mxu0  ;;  %v1411_v21 = vmax.f32 %v1283_v14, 0.0 }
 0x3bc   :  { %v1412_v19 = vmax.f32 %v1285_v16, 0.0  ;;  %v1287_v20 = vpop.f32.mrb[55].mxu0 }
 0x3bd   :  { %v1413_v22 = vmax.f32 %v1287_v20, 0.0 }
 0x3be   :  { %v1464_v23 = vpack.c.bf16 %v1412_v19, %v1410_v18 }
 0x3bf   :  { %v1465_v24 = vpack.c.bf16 %v1413_v22, %v1411_v21 }
 0x3c1   :  { %v1291_v25 = vpop.f32.mrb[56].mxu0  ;;  %1504 = vmatprep.subr.bf16.mxu1 %v1465_v24 }
 0x3c2   :  { %v1293_v26 = vpop.f32.mrb[57].mxu0  ;;  %1505 = vmatpush1.bf16.msra.mxu1 %v1464_v23  ;;  %v1414_v29 = vmax.f32 %v1291_v25, 0.0 }
 0x3c3   :  { %v1295_v27 = vpop.f32.mrb[58].mxu0  ;;  %v1415_v32 = vmax.f32 %v1293_v26, 0.0 }
 0x3c4   :  { %v1416_v30 = vmax.f32 %v1295_v27, 0.0  ;;  %v1297_v31 = vpop.f32.mrb[59].mxu0 }
 0x3c5   :  { %v1417_v33 = vmax.f32 %v1297_v31, 0.0 }
 0x3c6   :  { %v1466_v34 = vpack.c.bf16 %v1416_v30, %v1414_v29 }
 0x3c7   :  { %v1467_v36 = vpack.c.bf16 %v1417_v33, %v1415_v32 }
 0x3c9   :  { %v1301_v38 = vpop.f32.mrb[60].mxu0  ;;  %1506 = vmatprep.subr.bf16.mxu1 %v1467_v36 }
 0x3ca   :  { %v1303_v40 = vpop.f32.mrb[61].mxu0  ;;  %1507 = vmatpush1.bf16.msra.mxu1 %v1466_v34  ;;  %v1418_v43 = vmax.f32 %v1301_v38, 0.0 }
 0x3cb   :  { %v1305_v42 = vpop.f32.mrb[62].mxu0  ;;  %v1419_v46 = vmax.f32 %v1303_v40, 0.0 }
 0x3cc   :  { %v1420_v44 = vmax.f32 %v1305_v42, 0.0  ;;  %v1307_v45 = vpop.f32.mrb[63].mxu0 }
 0x3cd   :  { %v1421_v47 = vmax.f32 %v1307_v45, 0.0 }
 0x3ce   :  { %v1468_v48 = vpack.c.bf16 %v1420_v44, %v1418_v43 }
 0x3cf   :  { %v1469_v49 = vpack.c.bf16 %v1421_v47, %v1419_v46 }
 0x3d1   :  { %v1311_v50 = vpop.f32.mrb[64].mxu0  ;;  %1508 = vmatprep.subr.bf16.mxu1 %v1469_v49 }
 0x3d2   :  { %v1313_v51 = vpop.f32.mrb[65].mxu0  ;;  %1509 = vmatpush1.bf16.msra.mxu1 %v1468_v48  ;;  %v1422_v53 = vmax.f32 %v1311_v50, 0.0 }
 0x3d3   :  { %v1315_v52 = vpop.f32.mrb[66].mxu0  ;;  %v1423_v56 = vmax.f32 %v1313_v51, 0.0 }
 0x3d4   :  { %v1424_v54 = vmax.f32 %v1315_v52, 0.0  ;;  %v1317_v55 = vpop.f32.mrb[67].mxu0 }
 0x3d5   :  { %v1425_v58 = vmax.f32 %v1317_v55, 0.0 }
 0x3d6   :  { %v1470_v62 = vpack.c.bf16 %v1424_v54, %v1422_v53 }
 0x3d7   :  { %v1471_v63 = vpack.c.bf16 %v1425_v58, %v1423_v56 }
 0x3d9   :  { %v1321_v0 = vpop.f32.mrb[68].mxu0  ;;  %1510 = vmatprep.subr.bf16.mxu1 %v1471_v63 }
 0x3da   :  { %v1323_v1 = vpop.f32.mrb[69].mxu0  ;;  %1511 = vmatpush1.bf16.msra.mxu1 %v1470_v62  ;;  %v1426_v3 = vmax.f32 %v1321_v0, 0.0 }
 0x3db   :  { %v1325_v2 = vpop.f32.mrb[70].mxu0  ;;  %v1427_v59 = vmax.f32 %v1323_v1, 0.0 }
 0x3dc   :  { %v1428_v39 = vmax.f32 %v1325_v2, 0.0  ;;  %v1327_v41 = vpop.f32.mrb[71].mxu0 }
 0x3dd   :  { %v1429_v61 = vmax.f32 %v1327_v41, 0.0 }
 0x3de   :  { %v1472_v15 = vpack.c.bf16 %v1428_v39, %v1426_v3 }
 0x3df   :  { %v1473_v17 = vpack.c.bf16 %v1429_v61, %v1427_v59  ;;  %v1653_v61 = vcombine.low %v2026_v28, %v2026_v28 }
 0x3e1   :  { %v1331_v35 = vpop.f32.mrb[72].mxu0  ;;  %1512 = vmatprep.subr.bf16.mxu1 %v1473_v17 }
 0x3e2   :  { %v1333_v37 = vpop.f32.mrb[73].mxu0  ;;  %1513 = vmatpush1.bf16.msra.mxu1 %v1472_v15  ;;  %v1430_v60 = vmax.f32 %v1331_v35, 0.0 }
 0x3e3   :  { %v1335_v57 = vpop.f32.mrb[74].mxu0  ;;  %v1431_v6 = vmax.f32 %v1333_v37, 0.0 }
 0x3e4   :  { %v1432_v4 = vmax.f32 %v1335_v57, 0.0  ;;  %v1337_v5 = vpop.f32.mrb[75].mxu0 }
 0x3e5   :  { %v1433_v7 = vmax.f32 %v1337_v5, 0.0 }
 0x3e6   :  { %v1474_v8 = vpack.c.bf16 %v1432_v4, %v1430_v60 }
 0x3e7   :  { %v1475_v9 = vpack.c.bf16 %v1433_v7, %v1431_v6 }
 0x3e9   :  { %v1341_v10 = vpop.f32.mrb[76].mxu0  ;;  %1514 = vmatprep.subr.bf16.mxu1 %v1475_v9 }
 0x3ea   :  { %v1343_v11 = vpop.f32.mrb[77].mxu0  ;;  %1515 = vmatpush1.bf16.msra.mxu1 %v1474_v8  ;;  %v1434_v13 = vmax.f32 %v1341_v10, 0.0 }
 0x3eb   :  { %v1345_v12 = vpop.f32.mrb[78].mxu0  ;;  %v1435_v18 = vmax.f32 %v1343_v11, 0.0 }
 0x3ec   :  { %v1436_v14 = vmax.f32 %v1345_v12, 0.0  ;;  %v1347_v16 = vpop.f32.mrb[79].mxu0 }
 0x3ed   :  { %v1437_v19 = vmax.f32 %v1347_v16, 0.0 }
 0x3ee   :  { %v1476_v20 = vpack.c.bf16 %v1436_v14, %v1434_v13 }
 0x3ef   :  { %v1477_v21 = vpack.c.bf16 %v1437_v19, %v1435_v18 }
 0x3f1   :  { %v1351_v22 = vpop.f32.mrb[80].mxu0  ;;  %1516 = vmatprep.subr.bf16.mxu1 %v1477_v21 }
 0x3f2   :  { %v1353_v23 = vpop.f32.mrb[81].mxu0  ;;  %1517 = vmatpush1.bf16.msra.mxu1 %v1476_v20  ;;  %v1438_v25 = vmax.f32 %v1351_v22, 0.0 }
 0x3f3   :  { %v1355_v24 = vpop.f32.mrb[82].mxu0  ;;  %v1439_v29 = vmax.f32 %v1353_v23, 0.0 }
 0x3f4   :  { %v1440_v26 = vmax.f32 %v1355_v24, 0.0  ;;  %v1357_v27 = vpop.f32.mrb[83].mxu0 }
 0x3f5   :  { %v1441_v30 = vmax.f32 %v1357_v27, 0.0 }
 0x3f6   :  { %v1478_v31 = vpack.c.bf16 %v1440_v26, %v1438_v25 }
 0x3f7   :  { %v1479_v32 = vpack.c.bf16 %v1441_v30, %v1439_v29 }
 0x3f9   :  { %v1361_v33 = vpop.f32.mrb[84].mxu0  ;;  %1518 = vmatprep.subr.bf16.mxu1 %v1479_v32 }
 0x3fa   :  { %v1363_v34 = vpop.f32.mrb[85].mxu0  ;;  %1519 = vmatpush1.bf16.msra.mxu1 %v1478_v31  ;;  %v1442_v38 = vmax.f32 %v1361_v33, 0.0 }
 0x3fb   :  { %v1365_v36 = vpop.f32.mrb[86].mxu0  ;;  %v1443_v43 = vmax.f32 %v1363_v34, 0.0 }
 0x3fc   :  { %v1444_v40 = vmax.f32 %v1365_v36, 0.0  ;;  %v1367_v42 = vpop.f32.mrb[87].mxu0 }
 0x3fd   :  { %v1445_v44 = vmax.f32 %v1367_v42, 0.0 }
 0x3fe   :  { %v1480_v45 = vpack.c.bf16 %v1444_v40, %v1442_v38 }
 0x3ff   :  { %v1481_v46 = vpack.c.bf16 %v1445_v44, %v1443_v43 }
 0x401   :  { %v1371_v47 = vpop.f32.mrb[88].mxu0  ;;  %1520 = vmatprep.subr.bf16.mxu1 %v1481_v46 }
 0x402   :  { %v1373_v48 = vpop.f32.mrb[89].mxu0  ;;  %1521 = vmatpush1.bf16.msra.mxu1 %v1480_v45  ;;  %v1446_v50 = vmax.f32 %v1371_v47, 0.0 }
 0x403   :  { %v1375_v49 = vpop.f32.mrb[90].mxu0  ;;  %v1447_v53 = vmax.f32 %v1373_v48, 0.0 }
 0x404   :  { %v1448_v51 = vmax.f32 %v1375_v49, 0.0  ;;  %v1377_v52 = vpop.f32.mrb[91].mxu0 }
 0x405   :  { %v1449_v54 = vmax.f32 %v1377_v52, 0.0 }
 0x406   :  { %v1482_v55 = vpack.c.bf16 %v1448_v51, %v1446_v50 }
 0x407   :  { %v1483_v56 = vpack.c.bf16 %v1449_v54, %v1447_v53 }
 0x409   :  { %v1381_v58 = vpop.f32.mrb[92].mxu0  ;;  %1522 = vmatprep.subr.bf16.mxu1 %v1483_v56 }
 0x40a   :  { %v1383_v62 = vpop.f32.mrb[93].mxu0  ;;  %1523 = vmatpush1.bf16.msra.mxu1 %v1482_v55  ;;  %v1450_v0 = vmax.f32 %v1381_v58, 0.0 }
 0x40b   :  { %v1385_v63 = vpop.f32.mrb[94].mxu0  ;;  %v1451_v3 = vmax.f32 %v1383_v62, 0.0 }
 0x40c   :  { %v1452_v1 = vmax.f32 %v1385_v63, 0.0  ;;  %v1387_v2 = vpop.f32.mrb[95].mxu0 }
 0x40d   :  { %v1453_v39 = vmax.f32 %v1387_v2, 0.0 }
 0x40e   :  { %v1484_v41 = vpack.c.bf16 %v1452_v1, %v1450_v0 }
 0x40f   :  { %v1485_v59 = vpack.c.bf16 %v1453_v39, %v1451_v3 }
 0x411   :  { %1524 = vmatprep.subr.bf16.mxu1 %v1485_v59 }
 0x412   :  { %1525 = vmatpush1.bf16.msra.mxu1 %v1484_v41 }
 0x415   :  { %1527 = vmatmul.mubr.bf16.vlgmr.msra.gmra.mrb[96].mxu1 %v1653_v61 }
 0x4e8   :  { %v1528_v15 = vpop.f32.mrb[96].mxu1 }
 0x4e9   :  { %1535 = vst [vmem:[#allocation7] sm:$0xff] %v1528_v15  ;;  %v1530_v17 = vpop.f32.mrb[97].mxu1 }
 0x4ea   :  { %1536 = vst [vmem:[#allocation7 + $0x8] sm:$0xff] %v1530_v17  ;;  %v1532_v35 = vpop.f32.mrb[98].mxu1 }
 0x4eb   :  { %v1533_v37 = vpop.f32.mrb[99].mxu1 }
 0x4ec   :  { %1840 = shalt.err (!%p1837_p6)
}
 0x4ed   :  { %s1841_s8 = scalar_lea.hbm %s2049_s5, 256 }
 0x4ee   :  { %p1842_p7 = scmp.ne.s32.totalorder %s2049_s5, %s1841_s8  ;;  %p1845_p8 = scmp.lt.u32.totalorder %s1841_s8, %s2049_s5 }
 0x4f0   :  { %p1847_p9 = pnand %p1845_p8, %p1842_p7 }
 0x4f2   :  { %1850 = shalt.err (!%p1847_p9)
}
 0x4f3   :  { %1546 = dma.vmem_to_hbm [thread:$0]  %s1544_s29, 256, %s2049_s5, [#allocation4]  }
 0x4f4   :  { %1855 = dma.done.wait [#allocation4], 256  }
 0x4f5   :  { %1856 = vsyncadd [#allocation4], 4294967040 }
 0x4f6   :  { %1550 = vsyncpa [#allocation3], 1 }
 0x4f7   :  { %1551 = vsyncpa [#allocation6], 1 }
 0x4f8   :  { %1552 = vsyncpa [#allocation4], 1 }

</bundles_post_ra>
